<compile_context>
chip_gen: v7x
topology: tpu7x:2x2x1
jax: 0.10.0
libtpu: 0.0.40
codegen_flags: <defaults>
</compile_context>

<pallas_src>
import jax
import jax.numpy as jnp
from jax.experimental import pallas as pl
from jax.experimental.pallas import tpu as pltpu


def _round_up(x, m):
    return ((x + m - 1) // m) * m


def _make_mlp_kernel(layer_dims, w_offs, b_offs, use_fma_first, use_vpu_last,
                     compute_dtype):
    """Fused MLP kernel body.

    Refs: (x_ref, w_ref, b_ref, o_ref)
      x_ref : (in_size, bb)   activations, batch on lanes
      w_ref : packed weights  (rows, cols) in compute_dtype; last layer stored
              transposed when the VPU path is used
      b_ref : packed biases   (total_out, 1) f32
      o_ref : (out_size, bb)
    tanh after every layer except the last.
    """
    num_layers = len(layer_dims)

    def kernel(x_ref, w_ref, b_ref, o_ref):
        w_all = w_ref[...]                       # packed weights (compute dtype)
        b_all = b_ref[...].astype(jnp.float32)   # packed biases (R, 1)

        def w_slice(i):
            out_i, in_i = layer_dims[i]
            r = w_offs[i]
            if use_vpu_last and i == num_layers - 1:
                return w_all[r:r + in_i, 0:out_i]      # stored transposed
            return w_all[r:r + out_i, 0:in_i]

        def b_slice(i):
            out_i, _ = layer_dims[i]
            r = b_offs[i]
            return b_all[r:r + out_i, :]               # (out_i, 1)

        h = x_ref[...].astype(jnp.float32)             # (in_size, bb)

        for i in range(num_layers):
            out_i, in_i = layer_dims[i]
            is_last = i == num_layers - 1
            b_i = b_slice(i)

            if i == 0 and use_fma_first and not (is_last and use_vpu_last):
                # K = in_size is tiny (3): broadcast FMAs on the VPU instead of
                # a >97%-padded MXU pass.
                w_i = w_slice(i).astype(jnp.float32)   # (out_i, in_i)
                acc = b_i + w_i[:, 0:1] * h[0:1, :]
                for k in range(1, in_i):
                    acc = acc + w_i[:, k:k + 1] * h[k:k + 1, :]
                h = acc
            elif is_last and use_vpu_last:
                # Tiny final layer on VPU/XLU (multiply + cross-sublane sum);
                # frees MXU passes, VALU/XLU have slack in this kernel.
                w_t = w_slice(i).astype(jnp.float32)   # (in_i, out_i)
                rows = [jnp.sum(w_t[:, j:j + 1] * h, axis=0, keepdims=True)
                        for j in range(out_i)]
                h = (rows[0] if out_i == 1
                     else jnp.concatenate(rows, axis=0)) + b_i
            else:
                # Hidden layers on the MXU: bf16 operands, f32 accumulation.
                w_i = w_slice(i).astype(compute_dtype)
                h = jnp.dot(w_i, h.astype(compute_dtype),
                            preferred_element_type=jnp.float32) + b_i

            if not is_last:
                h = jnp.tanh(h)

        o_ref[...] = h.astype(o_ref.dtype)

    return kernel


def _pack_params(weights, biases, use_vpu_last, compute_dtype):
    """Packs all layer weights into one buffer and all biases into another.

    Weights: stacked along rows, zero-padded along columns to a common width.
    The last layer is stored transposed (in, out) when the VPU output path is
    used so its columns can be sliced directly as (K, 1) vectors.
    Biases: stacked as (total_out, 1) f32.
    Returns (w_pack, b_pack, w_row_offsets, b_row_offsets).
    """
    num_layers = len(weights)
    cols = 1
    for i, w in enumerate(weights):
        out_i, in_i = int(w.shape[0]), int(w.shape[1])
        cols = max(cols, out_i if (use_vpu_last and i == num_layers - 1) else in_i)

    w_blocks, w_offs, r = [], [], 0
    for i, w in enumerate(weights):
        out_i, in_i = int(w.shape[0]), int(w.shape[1])
        if use_vpu_last and i == num_layers - 1:
            blk, rr, cc = w.T, in_i, out_i
        else:
            blk, rr, cc = w, out_i, in_i
        w_offs.append(r)
        pad = jnp.zeros((rr, cols), jnp.float32).at[:, :cc].set(
            blk.astype(jnp.float32))
        w_blocks.append(pad)
        r += rr
    w_pack = jnp.concatenate(w_blocks, axis=0).astype(compute_dtype)

    b_blocks, b_offs, r = [], [], 0
    for b in biases:
        b_offs.append(r)
        b_blocks.append(jnp.reshape(b, (-1, 1)).astype(jnp.float32))
        r += int(b.shape[0])
    b_pack = jnp.concatenate(b_blocks, axis=0)

    return w_pack, b_pack, tuple(w_offs), tuple(b_offs)


def mlp_pallas(x, weights, biases, *, block_batch=32768,
               compute_dtype=jnp.bfloat16):
    """Runs the fused MLP forward pass.

    x          : (B, in_size)
    weights[i] : (out_i, in_i)   -- PyTorch-native nn.Linear.weight layout
    biases[i]  : (out_i,)        -- PyTorch-native nn.Linear.bias layout
    returns    : (B, out_size)

    compute_dtype=jnp.bfloat16 (default) feeds the MXU bf16 operands with f32
    accumulation (fast); jnp.float32 keeps everything fp32 (bit-accurate).
    """
    B, in_size = x.shape
    num_layers = len(weights)
    out_size = int(weights[-1].shape[0])
    layer_dims = tuple((int(w.shape[0]), int(w.shape[1])) for w in weights)

    use_fma_first = in_size <= 8
    use_vpu_last = out_size <= 8

    # Batch tile: multiple of 256 (full-width MXU feeds), capped so there are
    # at least 2 grid steps whenever the batch allows (keeps both v7x
    # TensorCores busy via the "parallel" grid axis).
    bb = min(int(block_batch), _round_up(pl.cdiv(B, 2), 256))
    bb = _round_up(max(bb, 256), 256)
    padded_B = _round_up(B, bb)
    grid = padded_B // bb

    # Batch-on-lanes layout: single transpose + pad (fuses under jit); padded
    # tail columns compute garbage and are sliced off afterwards.
    x_t = x.T
    if padded_B != B:
        x_t = jnp.pad(x_t, ((0, 0), (0, padded_B - B)))

    w_pack, b_pack, w_offs, b_offs = _pack_params(
        weights, biases, use_vpu_last, compute_dtype)

    kernel = _make_mlp_kernel(layer_dims, w_offs, b_offs, use_fma_first,
                              use_vpu_last, compute_dtype)

    in_specs = [
        pl.BlockSpec((in_size, bb), lambda i: (0, i)),
        pl.BlockSpec(w_pack.shape, lambda i: (0, 0)),
        pl.BlockSpec(b_pack.shape, lambda i: (0, 0)),
    ]
    out_spec = pl.BlockSpec((out_size, bb), lambda i: (0, i))

    grid_spec = pltpu.PrefetchScalarGridSpec(
        num_scalar_prefetch=0,
        grid=(grid,),
        in_specs=in_specs,
        out_specs=out_spec,
    )

    out_t = pl.pallas_call(
        kernel,
        out_shape=jax.ShapeDtypeStruct((out_size, padded_B), x.dtype),
        grid_spec=grid_spec,
        compiler_params=pltpu.CompilerParams(
            dimension_semantics=("parallel",),
            # Large batch tiles need more scoped VMEM than v5e's 16 MiB
            # default; 48 MiB is comfortably under v7x's 64 MiB physical.
            vmem_limit_bytes=48 * 1024 * 1024,
        ),
    )(x_t, w_pack, b_pack)

    return out_t[:, :B].T


def init_mlp_params(key, in_size, h_sizes, out_size):
    """PyTorch-Linear-style init: uniform(-1/sqrt(fan_in), 1/sqrt(fan_in))."""
    layer_sizes = [in_size] + list(h_sizes) + [out_size]
    weights, biases = [], []
    for fan_in, fan_out in zip(layer_sizes[:-1], layer_sizes[1:]):
        key, kw, kb = jax.random.split(key, 3)
        bound = 1.0 / jnp.sqrt(jnp.float32(fan_in))
        w = jax.random.uniform(kw, (fan_out, fan_in), jnp.float32, -bound, bound)
        b = jax.random.uniform(kb, (fan_out,), jnp.float32, -bound, bound)
        weights.append(w)
        biases.append(b)
    return weights, biases


def mlp_reference(x, weights, biases):
    """Plain-JAX reference matching the PyTorch module."""
    h = x
    for i, (w, b) in enumerate(zip(weights, biases)):
        h = h @ w.T + b
        if i < len(weights) - 1:
            h = jnp.tanh(h)
    return h


if __name__ == "__main__":
    # Shapes consistent with PCNN_Heat2D usage: (x, y, t) coordinate inputs,
    # a few hidden layers of width 32, scalar output u(x, y, t). Batch chosen
    # to exercise padding and to produce a 2-step grid.
    in_size = 3
    h_sizes = [32, 32, 32]
    out_size = 1
    batch = 300

    key = jax.random.PRNGKey(0)
    key, kx = jax.random.split(key)
    x = jax.random.normal(kx, (batch, in_size), jnp.float32)
    weights, biases = init_mlp_params(key, in_size, h_sizes, out_size)

    ref = mlp_reference(x, weights, biases)

    # Default (bf16 MXU operands, f32 accumulation) -- fast path.
    out_bf16 = jax.block_until_ready(mlp_pallas(x, weights, biases))
    assert out_bf16.shape == (batch, out_size)
    max_err = float(jnp.max(jnp.abs(out_bf16 - ref)))
    assert max_err < 5e-2, f"bf16 path error too large: {max_err}"

    # fp32 fallback path -- bit-accurate check of the kernel structure.
    out_f32 = jax.block_until_ready(
        mlp_pallas(x, weights, biases, compute_dtype=jnp.float32))
    assert jnp.allclose(out_f32, ref, atol=1e-5, rtol=1e-5), \
        "fp32 Pallas output mismatch vs reference"

    print("KERNEL_OK")
</pallas_src>

<mosaic_0001>
module attributes {stable_mosaic.version = 11 : i64} {
  func.func @kernel(%arg0: i32, %arg1: memref<3x256xf32, #tpu.memory_space<vmem>>, %arg2: memref<128x32xbf16, #tpu.memory_space<vmem>>, %arg3: memref<97x1xf32, #tpu.memory_space<vmem>>, %arg4: memref<1x256xf32, #tpu.memory_space<vmem>>) attributes {dimension_semantics = [#tpu.dimension_semantics<parallel>], iteration_bounds = array<i64: 2>, scalar_prefetch = 0 : i64, scratch_operands = 0 : i64, tpu.core_type = #tpu.core_type<tc>, window_params = [{transform_indices = @transform_0, window_bounds = array<i64: 3, 256>}, {pipeline_mode = #tpu.pipeline_mode<synchronous>, transform_indices = @transform_1, window_bounds = array<i64: 128, 32>}, {pipeline_mode = #tpu.pipeline_mode<synchronous>, transform_indices = @transform_2, window_bounds = array<i64: 97, 1>}, {transform_indices = @transform_3, window_bounds = array<i64: 1, 256>}]} {
    %c0 = arith.constant 0 : index
    %c0_0 = arith.constant 0 : index
    %0 = vector.load %arg2[%c0, %c0_0] : memref<128x32xbf16, #tpu.memory_space<vmem>>, vector<128x32xbf16>
    %c0_1 = arith.constant 0 : index
    %c0_2 = arith.constant 0 : index
    %1 = vector.load %arg3[%c0_1, %c0_2] : memref<97x1xf32, #tpu.memory_space<vmem>>, vector<97x1xf32>
    %c0_3 = arith.constant 0 : index
    %c0_4 = arith.constant 0 : index
    %2 = vector.load %arg1[%c0_3, %c0_4] : memref<3x256xf32, #tpu.memory_space<vmem>>, vector<3x256xf32>
    %3 = vector.extract_strided_slice %1 {offsets = [0, 0], sizes = [32, 1], strides = [1, 1]} : vector<97x1xf32> to vector<32x1xf32>
    %4 = vector.extract_strided_slice %0 {offsets = [0, 0], sizes = [32, 3], strides = [1, 1]} : vector<128x32xbf16> to vector<32x3xbf16>
    %5 = arith.extf %4 : vector<32x3xbf16> to vector<32x3xf32>
    %6 = vector.extract_strided_slice %5 {offsets = [0, 0], sizes = [32, 1], strides = [1, 1]} : vector<32x3xf32> to vector<32x1xf32>
    %7 = vector.extract_strided_slice %2 {offsets = [0, 0], sizes = [1, 256], strides = [1, 1]} : vector<3x256xf32> to vector<1x256xf32>
    %8 = vector.broadcast %6 : vector<32x1xf32> to vector<32x256xf32>
    %9 = vector.broadcast %7 : vector<1x256xf32> to vector<32x256xf32>
    %10 = arith.mulf %8, %9 : vector<32x256xf32>
    %11 = vector.broadcast %3 : vector<32x1xf32> to vector<32x256xf32>
    %12 = arith.addf %11, %10 : vector<32x256xf32>
    %13 = vector.extract_strided_slice %5 {offsets = [0, 1], sizes = [32, 1], strides = [1, 1]} : vector<32x3xf32> to vector<32x1xf32>
    %14 = vector.extract_strided_slice %2 {offsets = [1, 0], sizes = [1, 256], strides = [1, 1]} : vector<3x256xf32> to vector<1x256xf32>
    %15 = vector.broadcast %13 : vector<32x1xf32> to vector<32x256xf32>
    %16 = vector.broadcast %14 : vector<1x256xf32> to vector<32x256xf32>
    %17 = arith.mulf %15, %16 : vector<32x256xf32>
    %18 = arith.addf %12, %17 : vector<32x256xf32>
    %19 = vector.extract_strided_slice %5 {offsets = [0, 2], sizes = [32, 1], strides = [1, 1]} : vector<32x3xf32> to vector<32x1xf32>
    %20 = vector.extract_strided_slice %2 {offsets = [2, 0], sizes = [1, 256], strides = [1, 1]} : vector<3x256xf32> to vector<1x256xf32>
    %21 = vector.broadcast %19 : vector<32x1xf32> to vector<32x256xf32>
    %22 = vector.broadcast %20 : vector<1x256xf32> to vector<32x256xf32>
    %23 = arith.mulf %21, %22 : vector<32x256xf32>
    %24 = arith.addf %18, %23 : vector<32x256xf32>
    %25 = math.tanh %24 : vector<32x256xf32>
    %26 = vector.extract_strided_slice %1 {offsets = [32, 0], sizes = [32, 1], strides = [1, 1]} : vector<97x1xf32> to vector<32x1xf32>
    %27 = vector.extract_strided_slice %0 {offsets = [32, 0], sizes = [32, 32], strides = [1, 1]} : vector<128x32xbf16> to vector<32x32xbf16>
    %28 = arith.truncf %25 : vector<32x256xf32> to vector<32x256xbf16>
    %cst = arith.constant dense<0.000000e+00> : vector<32x256xf32>
    %29 = tpu.matmul %27, %28, %cst {dimension_numbers = #tpu.dot_dimension_numbers<[1], [0], [0], [1], [0, 0, 1, 1], [], []>} : vector<32x32xbf16>, vector<32x256xbf16>, vector<32x256xf32> -> vector<32x256xf32>
    %30 = vector.broadcast %26 : vector<32x1xf32> to vector<32x256xf32>
    %31 = arith.addf %29, %30 : vector<32x256xf32>
    %32 = math.tanh %31 : vector<32x256xf32>
    %33 = vector.extract_strided_slice %1 {offsets = [64, 0], sizes = [32, 1], strides = [1, 1]} : vector<97x1xf32> to vector<32x1xf32>
    %34 = vector.extract_strided_slice %0 {offsets = [64, 0], sizes = [32, 32], strides = [1, 1]} : vector<128x32xbf16> to vector<32x32xbf16>
    %35 = arith.truncf %32 : vector<32x256xf32> to vector<32x256xbf16>
    %cst_5 = arith.constant dense<0.000000e+00> : vector<32x256xf32>
    %36 = tpu.matmul %34, %35, %cst_5 {dimension_numbers = #tpu.dot_dimension_numbers<[1], [0], [0], [1], [0, 0, 1, 1], [], []>} : vector<32x32xbf16>, vector<32x256xbf16>, vector<32x256xf32> -> vector<32x256xf32>
    %37 = vector.broadcast %33 : vector<32x1xf32> to vector<32x256xf32>
    %38 = arith.addf %36, %37 : vector<32x256xf32>
    %39 = math.tanh %38 : vector<32x256xf32>
    %40 = vector.extract_strided_slice %1 {offsets = [96, 0], sizes = [1, 1], strides = [1, 1]} : vector<97x1xf32> to vector<1x1xf32>
    %41 = vector.extract_strided_slice %0 {offsets = [96, 0], sizes = [32, 1], strides = [1, 1]} : vector<128x32xbf16> to vector<32x1xbf16>
    %42 = arith.extf %41 : vector<32x1xbf16> to vector<32x1xf32>
    %43 = vector.broadcast %42 : vector<32x1xf32> to vector<32x256xf32>
    %44 = arith.mulf %43, %39 : vector<32x256xf32>
    %cst_6 = arith.constant dense<0.000000e+00> : vector<256xf32>
    %45 = vector.multi_reduction <add>, %44, %cst_6 [0] : vector<32x256xf32> to vector<256xf32>
    %46 = vector.shape_cast %45 : vector<256xf32> to vector<1x256xf32>
    %47 = vector.broadcast %40 : vector<1x1xf32> to vector<1x256xf32>
    %48 = arith.addf %46, %47 : vector<1x256xf32>
    %c0_7 = arith.constant 0 : index
    %c0_8 = arith.constant 0 : index
    %49 = vector.load %arg4[%c0_7, %c0_8] : memref<1x256xf32, #tpu.memory_space<vmem>>, vector<1x256xf32>
    tpu.vector_store %arg4[%c0_7, %c0_8], %48 {strides = array<i32>} : memref<1x256xf32, #tpu.memory_space<vmem>>, vector<1x256xf32>,
    return
  }
  func.func @transform_0(%arg0: i32) -> (i32, i32) {
    %c0_i32 = arith.constant 0 : i32
    %c0_i32_0 = arith.constant 0 : i32
    return %c0_i32, %arg0 : i32, i32
  }
  func.func @transform_1(%arg0: i32) -> (i32, i32) {
    %c0_i32 = arith.constant 0 : i32
    %c0_i32_0 = arith.constant 0 : i32
    %c0_i32_1 = arith.constant 0 : i32
    return %c0_i32, %c0_i32_0 : i32, i32
  }
  func.func @transform_2(%arg0: i32) -> (i32, i32) {
    %c0_i32 = arith.constant 0 : i32
    %c0_i32_0 = arith.constant 0 : i32
    %c0_i32_1 = arith.constant 0 : i32
    return %c0_i32, %c0_i32_0 : i32, i32
  }
  func.func @transform_3(%arg0: i32) -> (i32, i32) {
    %c0_i32 = arith.constant 0 : i32
    %c0_i32_0 = arith.constant 0 : i32
    return %c0_i32, %arg0 : i32, i32
  }
}

</mosaic_0001>

<bundles_post_ra>
// kernel: tpu_custom_call.1
= control target key start
LH: loop header
LB: loop body
LE: loop exit
PB: predicated region body
PF: predicated region fallthrough
CT: control target
= control target key end

     0   :  { %8 = vsyncpa [#allocation3], 0  ;;  %s1201_s0 = inlined_call_operand.vmem [shape: f32[3,512], index: 0, kind: input, shape index: {}]   ;;  %s1202_s1 = inlined_call_operand.vmem [shape: bf16[128,32], index: 1, kind: input, shape index: {}]   ;;  %s1203_s2 = inlined_call_operand.vmem [shape: f32[97,1], index: 2, kind: input, shape index: {}]   ;;  %s1204_s3 = inlined_call_operand.hbm [shape: f32[1,512], index: 3, kind: output, shape index: {}]  }
   0x1   :  { %10 = vsyncpa [#allocation3 + $0x1], 0  ;;  %s1015_s12 = smov 0   ;;  %s1017_s13 = smov 0  }
   0x2   :  { %s1019_s14 = smov 0   ;;  %s1021_s15 = smov 0  }
   0x3 LB: > { %s1036_s16 = sadd.s32 4294967295, %s988_s15   ;;  %s747_s17 = sadd.s32 4294967294, %s988_s15   ;;  %s988_s15 = sphi %s1021_s15, %s1210_s15   ;;  %s984_s14 = sphi %s1019_s14, %s1209_s14   ;;  %s980_s13 = sphi %s1017_s13, %s1208_s13   ;;  %s976_s12 = sphi %s1015_s12, %s1207_s12  }
   0x4   : > { %s1040_s18 = sadd.s32 1, %s988_s15   ;;  %s91_s19 = sadd.s32 1, %s984_s14 }
   0x5   : > { %s88_s20 = ssub.s32 %s988_s15, %s1040_s18  ;;  %p101_p0 = scmp.ne.s32.totalorder %s984_s14, %s980_s13 }
   0x6   : > { %p89_p1 = scmp.eq.s32.totalorder %s88_s20, 0  ;;  %p102_p2 = scmp.eq.s32.totalorder %s1036_s16, 1 }
   0x7   : > { %p107_p3 = scmp.ne.s32.totalorder %s980_s13, %s976_s12  ;;  %p108_p4 = scmp.eq.s32.totalorder %s747_s17, 1 }
   0x8   : > { %s1051_s21 = scalar_select %p89_p1, %s984_s14, %s91_s19  }
   0x9   : > { %p1053_p5 = por %p102_p2, %p101_p0  ;;  %p1057_p6 = por %p108_p4, %p107_p3 }
   0xa   : > { %p750_p7 = scmp.ge.s32.totalorder %s988_s15, 1  ;;  %p141_p8 = scmp.lt.s32.totalorder %s988_s15, 3 }
   0xc   : > { %p142_p9 = pnand %p750_p7, %p141_p8 }
   0xd   : > { %v190_v0 = vld [vmem:[%s1203_s2 + $0x8] sm:$0xff] (!%p142_p9)  ;;  %v769_v1 = vld [vmem:[%s1202_s1] sm:$0xff] (!%p142_p9)   ;;  %v990_v2 = vmov (!%p142_p9), 0   ;;  %v991_v9 = vmov (!%p142_p9), 1   ;;  %v992_v12 = vmov (!%p142_p9), 2   ;;  %v192_v13 = vld [vmem:[%s1203_s2 + $0x18] sm:$0xff] (!%p142_p9)  ;;  %v228_v31 = vlaneseq (!%p142_p9) }
   0xe   : > { %145 = sbr.rel (%p142_p9) target bundleno = 707 (0x2c3), region = 32  ;;  %836 = vset.pattern.permute.xlu1 (!%p142_p9), %v990_v2  ;;  %830 = vset.pattern.permute.xlu0 (!%p142_p9), %v990_v2  ;;  %v770_v3 = vunpack.c.l.bf16 (!%p142_p9), %v769_v1  ;;  %v771_v4 = vunpack.c.h.bf16 (!%p142_p9), %v769_v1  ;;  %v784_v5 = vld [vmem:[%s1202_s1 + $0x8] sm:$0xff] (!%p142_p9)   ;;  %v189_v10 = vld [vmem:[%s1203_s2] sm:$0xff] (!%p142_p9)  ;;  %v191_v14 = vld [vmem:[%s1203_s2 + $0x10] sm:$0xff] (!%p142_p9)  ;;  %s752_s19 = sshll.u32 (!%p142_p9), %s1036_s16, 1  ;;  %vm424_vm0 = vcmask (!%p142_p9), 261120  }
   0xf   : > { %261 = vperm.xlu1 (!%p142_p9), %836, %v190_v0   ;;  %463 = vmatprep.mubr.bf16.mxu0 (!%p142_p9), %v990_v2  ;;  %v774_v7 = vunpack.c.l.bf16 (!%p142_p9), %v784_v5  ;;  %v775_v8 = vunpack.c.h.bf16 (!%p142_p9), %v784_v5  ;;  %v193_v15 = vld [vmem:[%s1203_s2 + $0x20] sm:$0xff] (!%p142_p9)  ;;  %v194_v16 = vld [vmem:[%s1203_s2 + $0x28] sm:$0xff] (!%p142_p9)  ;;  %v195_v17 = vld [vmem:[%s1203_s2 + $0x30] sm:$0xff] (!%p142_p9)  ;;  %p166_p10 = scmp.lt.s32.totalorder (!%p142_p9), %s752_s19, 3  ;;  %v1123_v32 = vshrl.u32 (!%p142_p9), %v228_v31, 7  ;;  %s162_s8 = sand.u32 (!%p142_p9), 1, %s980_s13  }
  0x10   : > { %v831_v6 = vpack.i.bf16 (!%p142_p9), %v771_v4, %v770_v3  ;;  %564 = vmatprep.mubr.bf16.mxu1 (!%p142_p9), %v990_v2  ;;  %v197_v18 = vld [vmem:[%s1203_s2 + $0x40] sm:$0xff] (!%p142_p9)  ;;  %v785_v19 = vld [vmem:[%s1202_s1 + $0x30] sm:$0xff] (!%p142_p9)   ;;  %v196_v20 = vld [vmem:[%s1203_s2 + $0x38] sm:$0xff] (!%p142_p9)  ;;  %s751_s9 = sshll.u32 (!%p142_p9), %s162_s8, 1  ;;  %s767_s10 = sshll.u32 (!%p142_p9), %s1036_s16, 5  ;;  %vm670_vm1 = vcmp.lt.s32.totalorder (!%p142_p9), %v228_v31, 256 }
  0x11   : > { %v843_v11 = vpack.i.bf16 (!%p142_p9), %v775_v8, %v774_v7  ;;  %v778_v21 = vunpack.c.l.bf16 (!%p142_p9), %v785_v19  ;;  %v779_v22 = vunpack.c.h.bf16 (!%p142_p9), %v785_v19  ;;  %v199_v23 = vld [vmem:[%s1203_s2 + $0x50] sm:$0xff] (!%p142_p9)  ;;  %v198_v24 = vld [vmem:[%s1203_s2 + $0x48] sm:$0xff] (!%p142_p9)  ;;  %v786_v26 = vld [vmem:[%s1202_s1 + $0x38] sm:$0xff] (!%p142_p9)   ;;  %v230_v33 = vsub.s32 (!%p142_p9), 0, %v1123_v32  ;;  %s164_s11 = scalar_lea.vmem (!%p142_p9), [#allocation2], %s751_s9  ;;  %s1159_s24 = scalar_lea.hbm (!%p142_p9), %s1204_s3, %s767_s10 }
  0x12   : > { %832 = vperm.xlu0 (!%p142_p9), %830, %v831_v6   ;;  %v200_v27 = vld [vmem:[%s1203_s2 + $0x58] sm:$0xff] (!%p142_p9)  ;;  %v783_v28 = vunpack.c.h.bf16 (!%p142_p9), %v786_v26  ;;  %v782_v29 = vunpack.c.l.bf16 (!%p142_p9), %v786_v26  ;;  %v201_v30 = vld [vmem:[%s1203_s2 + $0x60] sm:$0x1] (!%p142_p9)  ;;  %v234_v34 = vsub.s32 (!%p142_p9), 4, %v1123_v32  ;;  %v300_v36 = vsub.s32 (!%p142_p9), 1, %v1123_v32  ;;  %s688_s17 = sshll.u32 (!%p142_p9), %s164_s11, 4  ;;  %s1161_s17 = int_to_ptr.vmem [resolvable:$true] %s688_s17 }
  0x13   : > { %837 = vset.pattern.permute.xlu1 (!%p142_p9), %v991_v9  ;;  %v869_v25 = vpack.i.bf16 (!%p142_p9), %v779_v22, %v778_v21  ;;  %v304_v37 = vsub.s32 (!%p142_p9), 5, %v1123_v32  ;;  %v350_v43 = vsub.s32 (!%p142_p9), 2, %v1123_v32  ;;  %v354_v45 = vsub.s32 (!%p142_p9), 6, %v1123_v32  ;;  %s674_s25 = scalar_lea.sflag (!%p142_p9), [#allocation3], %s162_s8  ;;  %s994_s16 = smov (!%p142_p9), [#allocation2]  }
  0x14   : > { %839 = vperm.xlu1 (!%p142_p9), %837, %v831_v6   ;;  %s930_s27 = sshll.u32 (!%p142_p9), %s994_s16, 4  ;;  %s931_s27 = int_to_ptr.vmem [resolvable:$false] %s930_s27 }
  0x15   : > { %s1212_s19 = smov (!%p166_p10, %s752_s19), 3  ;;  %s932_s28 = scalar_lea.vmem %s931_s27, 64 }
  0x16   : > { %256 = vperm.xlu0 %830, %v189_v10   ;;  %s753_s20 = sshll.u32 %s1212_s19, 2  ;;  %p933_p0 = scmp.lt.s32.totalorder %s1161_s17, %s931_s27 }
  0x17   : > { %s169_s26 = scalar_lea.vmem %s1201_s0, %s753_s20 }
  0x18   : > { %848 = vset.pattern.permute.xlu1 %v992_v12  ;;  %v202_v35 = vld [vmem:[%s169_s26] sm:$0x77]  ;;  %s926_s26 = scalar_lea.vmem %s1161_s17, 32 }
  0x19   : > { %850 = vperm.xlu1 %848, %v831_v6   ;;  %v231_v38 = vrot.slane %v202_v35, %v230_v33  ;;  %v235_v39 = vrot.slane %v202_v35, %v234_v34  ;;  %v301_v41 = vrot.slane %v202_v35, %v300_v36  ;;  %v305_v42 = vrot.slane %v202_v35, %v304_v37  ;;  %p927_p11 = scmp.ne.s32.totalorder %s1161_s17, %s926_s26  ;;  %p934_p1 = scmp.lt.s32.totalorder %s932_s28, %s926_s26 }
  0x1a   : > { %844 = vperm.xlu0 %830, %v843_v11   ;;  %v351_v53 = vrot.slane %v202_v35, %v350_v43  ;;  %v355_v57 = vrot.slane %v202_v35, %v354_v45 }
  0x1b   : > { %v241_v44 = vrot.slane %v231_v38, %v230_v33  ;;  %v245_v47 = vrot.slane %v235_v39, %v230_v33  ;;  %v311_v50 = vrot.slane %v301_v41, %v300_v36  ;;  %v315_v52 = vrot.slane %v305_v42, %v300_v36  ;;  %p928_p12 = pnand %p927_p11, %p1053_p5  ;;  %p935_p2 = por %p934_p1, %p933_p0 }
  0x1c   : > { %v361_v6 = vrot.slane %v351_v53, %v350_v43  ;;  %v365_v7 = vrot.slane %v355_v57, %v350_v43 }
  0x1d   : > { %854 = vset.pattern.permute.xlu1 %v990_v2  ;;  %p929_p13 = pneg %p928_p12 }
  0x1e   : > { %271 = vperm.xlu1 %854, %v192_v13   ;;  %266 = vperm.xlu0 %830, %v191_v14  }
  0x1f   : > { %p936_p3 = pnand %p935_p2, %p929_p13 }
  0x22   : > { %855 = vset.pattern.permute.xlu0 %v991_v9  ;;  %861 = vset.pattern.permute.xlu1 %v992_v12 }
  0x23   : > { %857 = vperm.xlu0 %855, %v843_v11   ;;  %863 = vperm.xlu1 %861, %v843_v11  }
  0x27   : > { %867 = vset.pattern.permute.xlu1 %v990_v2  ;;  %868 = vset.pattern.permute.xlu0 %v990_v2 }
  0x28   : > { %396 = vperm.xlu1 %867, %v193_v15   ;;  %401 = vperm.xlu0 %868, %v194_v16  }
  0x2c   : > { %406 = vperm.xlu1 %867, %v195_v17   ;;  %498 = vperm.xlu0 %868, %v197_v18  }
  0x30   : > { %411 = vperm.xlu1 %867, %v196_v20   ;;  %508 = vperm.xlu0 %868, %v199_v23  }
  0x34   : > { %503 = vperm.xlu1 %867, %v198_v24   ;;  %870 = vperm.xlu0 %868, %v869_v25  }
  0x38   : > { %513 = vperm.xlu1 %867, %v200_v27   ;;  %614 = vperm.xlu0 %868, %v783_v28  }
  0x3c   : > { %609 = vperm.xlu1 %867, %v782_v29  }
  0x40   : > { %645 = vperm.xlu1 %867, %v201_v30  }
  0x8e   : > { %v262_v40 = vpop.permute.xlu1 %261 }
  0x91   : > { %v833_v46 = vpop.permute.xlu0 %832 }
  0x92   : > { %v835_v48 = vunpack.i.h.bf16 %v833_v46  ;;  %v834_v49 = vunpack.i.l.bf16 %v833_v46 }
  0x93   : > { %v840_v51 = vpop.permute.xlu1 %839 }
  0x94   : > { %v248_v54 = vmul.f32 %v835_v48, %v241_v44  ;;  %v842_v55 = vunpack.i.h.bf16 %v840_v51  ;;  %v841_v56 = vunpack.i.l.bf16 %v840_v51  ;;  %v249_v58 = vmul.f32 %v835_v48, %v245_v47 }
  0x95   : > { %v257_v59 = vpop.permute.xlu0 %256  ;;  %v246_v60 = vmul.f32 %v834_v49, %v241_v44  ;;  %v247_v61 = vmul.f32 %v834_v49, %v245_v47 }
  0x96   : > { %v276_v62 = vadd.f32 %v262_v40, %v248_v54  ;;  %v316_v63 = vmul.f32 %v841_v56, %v311_v50  ;;  %v317_v0 = vmul.f32 %v841_v56, %v315_v52  ;;  %v318_v1 = vmul.f32 %v842_v55, %v311_v50 }
  0x97   : > { %v274_v3 = vadd.f32 %v257_v59, %v246_v60  ;;  %v275_v4 = vadd.f32 %v257_v59, %v247_v61  ;;  %v277_v8 = vadd.f32 %v262_v40, %v249_v58  ;;  %v319_v9 = vmul.f32 %v842_v55, %v315_v52 }
  0x98   : > { %v851_v5 = vpop.permute.xlu1 %850  ;;  %v326_v14 = vadd.f32 %v318_v1, %v276_v62 }
  0x99   : > { %v845_v10 = vpop.permute.xlu0 %844  ;;  %v853_v11 = vunpack.i.h.bf16 %v851_v5  ;;  %v852_v12 = vunpack.i.l.bf16 %v851_v5  ;;  %v324_v15 = vadd.f32 %v316_v63, %v274_v3  ;;  %v325_v16 = vadd.f32 %v317_v0, %v275_v4 }
  0x9a   : > { %v847_v13 = vunpack.i.h.bf16 %v845_v10  ;;  %v846_v17 = vunpack.i.l.bf16 %v845_v10  ;;  %v327_v22 = vadd.f32 %v319_v9, %v277_v8  ;;  %v874_v10 = vld [vmem:[%s1202_s1 + $0x10] sm:$0xff]  }
  0x9b   : > { %v366_v18 = vmul.f32 %v852_v12, %v361_v6  ;;  %v367_v19 = vmul.f32 %v852_v12, %v365_v7  ;;  %v368_v20 = vmul.f32 %v853_v11, %v361_v6  ;;  %v369_v21 = vmul.f32 %v853_v11, %v365_v7  ;;  %v875_v11 = vld [vmem:[%s1202_s1 + $0x18] sm:$0xff]  }
  0x9c   : > { %v252_v28 = vmul.f32 %v847_v13, %v241_v44  ;;  %v253_v30 = vmul.f32 %v847_v13, %v245_v47  ;;  %v250_v33 = vmul.f32 %v846_v17, %v241_v44  ;;  %v251_v34 = vmul.f32 %v846_v17, %v245_v47 }
  0x9d   : > { %v267_v23 = vpop.permute.xlu0 %266  ;;  %v374_v24 = vadd.f32 %v366_v18, %v324_v15  ;;  %v375_v25 = vadd.f32 %v367_v19, %v325_v16  ;;  %v376_v26 = vadd.f32 %v368_v20, %v326_v14  ;;  %v272_v27 = vpop.permute.xlu1 %271  ;;  %v377_v29 = vadd.f32 %v369_v21, %v327_v22 }
  0x9e   : > { %v280_v35 = vadd.f32 %v272_v27, %v252_v28  ;;  %v281_v41 = vadd.f32 %v272_v27, %v253_v30  ;;  %v278_v42 = vadd.f32 %v267_v23, %v250_v33  ;;  %v279_v43 = vadd.f32 %v267_v23, %v251_v34 }
  0x9f   : > { %878 = vtanh.f32 %v374_v24 }
  0xa0   : > { %880 = vtanh.f32 %v375_v25 }
  0xa1   : > { %882 = vtanh.f32 %v376_v26 }
  0xa2   : > { %v858_v36 = vpop.permute.xlu0 %857  ;;  %v864_v37 = vpop.permute.xlu1 %863  ;;  %884 = vtanh.f32 %v377_v29 }
  0xa3   : > { %v860_v38 = vunpack.i.h.bf16 %v858_v36  ;;  %v859_v39 = vunpack.i.l.bf16 %v858_v36  ;;  %v866_v40 = vunpack.i.h.bf16 %v864_v37  ;;  %v865_v45 = vunpack.i.l.bf16 %v864_v37 }
  0xa5   : > { %v320_v46 = vmul.f32 %v859_v39, %v311_v50  ;;  %v321_v48 = vmul.f32 %v859_v39, %v315_v52  ;;  %v322_v49 = vmul.f32 %v860_v38, %v311_v50  ;;  %v323_v51 = vmul.f32 %v860_v38, %v315_v52 }
  0xa6   : > { %v370_v53 = vmul.f32 %v865_v45, %v361_v6  ;;  %v371_v44 = vmul.f32 %v865_v45, %v365_v7  ;;  %v372_v47 = vmul.f32 %v866_v40, %v361_v6  ;;  %v373_v54 = vmul.f32 %v866_v40, %v365_v7 }
  0xa7   : > { %v328_v55 = vadd.f32 %v320_v46, %v278_v42  ;;  %v329_v56 = vadd.f32 %v321_v48, %v279_v43  ;;  %v330_v57 = vadd.f32 %v322_v49, %v280_v35  ;;  %v331_v58 = vadd.f32 %v323_v51, %v281_v41  ;;  %v397_v12 = vpop.permute.xlu1 %396  ;;  %v402_v16 = vpop.permute.xlu0 %401  ;;  %v876_v48 = vld [vmem:[%s1202_s1 + $0x20] sm:$0xff]   ;;  %v877_v49 = vld [vmem:[%s1202_s1 + $0x28] sm:$0xff]  }
  0xa9   : > { %v378_v59 = vadd.f32 %v370_v53, %v328_v55  ;;  %v379_v60 = vadd.f32 %v371_v44, %v329_v56  ;;  %v380_v61 = vadd.f32 %v372_v47, %v330_v57  ;;  %v879_v62 = vpop.eup %878  ;;  %v381_v63 = vadd.f32 %v373_v54, %v331_v58 }
  0xaa   : > { %v881_v0 = vpop.eup %880 }
  0xab   : > { %886 = vtanh.f32 %v378_v59  ;;  %v883_v1 = vpop.eup %882  ;;  %v407_v21 = vpop.permute.xlu1 %406 }
  0xac   : > { %888 = vtanh.f32 %v379_v60  ;;  %v885_v3 = vpop.eup %884  ;;  %v390_v50 = vpack.c.bf16 %v883_v1, %v879_v62  ;;  %v499_v51 = vpop.permute.xlu0 %498 }
  0xad   : > { %890 = vtanh.f32 %v380_v61  ;;  %v391_v52 = vpack.c.bf16 %v885_v3, %v881_v0 }
  0xae   : > { %892 = vtanh.f32 %v381_v63 }
  0xaf   : > { %431 = vmatprep.subr.bf16.mxu0 %v391_v52  ;;  %v412_v26 = vpop.permute.xlu1 %411 }
  0xb0   : > { %432 = vmatpush1.bf16.msra.mxu0 %v390_v50 }
  0xb3   : > { %v504_v54 = vpop.permute.xlu1 %503 }
  0xb5   : > { %v887_v4 = vpop.eup %886 }
  0xb6   : > { %v889_v5 = vpop.eup %888 }
  0xb7   : > { %v891_v6 = vpop.eup %890  ;;  %v514_v63 = vpop.permute.xlu1 %513 }
  0xb8   : > { %v893_v7 = vpop.eup %892  ;;  %v392_v8 = vpack.c.bf16 %v891_v6, %v887_v4 }
  0xb9   : > { %v393_v9 = vpack.c.bf16 %v893_v7, %v889_v5 }
  0xbb   : > { %433 = vmatprep.subr.bf16.mxu0 %v393_v9 }
  0xbc   : > { %434 = vmatpush1.bf16.msra.mxu0 %v392_v8 }
  0xbf   : > { %756 = vmatmul.mubr.msk.bf16.vlgmr.msra.gmra.mrb[0].mxu0 %vm424_vm0, %v874_v10 }
  0xc0   : > { %473 = vmatprep.mubr.bf16.mxu0 %v990_v2 }
  0xc7   : > { %757 = vmatmul.mubr.msk.bf16.gmra.mrb[4].mxu0 %vm424_vm0, %v875_v11 }
 0x192   : > { %v465_v13 = vpop.f32.mrb[0].mxu0 }
 0x193   : > { %v466_v14 = vadd.f32 %v465_v13, %v397_v12  ;;  %v467_v15 = vpop.f32.mrb[1].mxu0 }
 0x194   : > { %v468_v17 = vadd.f32 %v467_v15, %v397_v12  ;;  %v469_v18 = vpop.f32.mrb[2].mxu0 }
 0x195   : > { %894 = vtanh.f32 %v466_v14  ;;  %v470_v19 = vadd.f32 %v469_v18, %v402_v16  ;;  %v471_v20 = vpop.f32.mrb[3].mxu0  ;;  %v610_v18 = vpop.permute.xlu1 %609 }
 0x196   : > { %896 = vtanh.f32 %v468_v17  ;;  %v472_v22 = vadd.f32 %v471_v20, %v402_v16 }
 0x197   : > { %898 = vtanh.f32 %v470_v19 }
 0x198   : > { %900 = vtanh.f32 %v472_v22 }
 0x19a   : > { %v475_v23 = vpop.f32.mrb[4].mxu0 }
 0x19b   : > { %v476_v24 = vadd.f32 %v475_v23, %v407_v21  ;;  %v477_v25 = vpop.f32.mrb[5].mxu0 }
 0x19c   : > { %v478_v27 = vadd.f32 %v477_v25, %v407_v21  ;;  %v479_v28 = vpop.f32.mrb[6].mxu0 }
 0x19d   : > { %902 = vtanh.f32 %v476_v24  ;;  %v480_v29 = vadd.f32 %v479_v28, %v412_v26  ;;  %v481_v30 = vpop.f32.mrb[7].mxu0 }
 0x19e   : > { %904 = vtanh.f32 %v478_v27  ;;  %v482_v33 = vadd.f32 %v481_v30, %v412_v26 }
 0x19f   : > { %v895_v34 = vpop.eup %894  ;;  %906 = vtanh.f32 %v480_v29 }
 0x1a0   : > { %v897_v35 = vpop.eup %896  ;;  %908 = vtanh.f32 %v482_v33 }
 0x1a1   : > { %v899_v36 = vpop.eup %898 }
 0x1a2   : > { %v901_v37 = vpop.eup %900  ;;  %v492_v38 = vpack.c.bf16 %v899_v36, %v895_v34 }
 0x1a3   : > { %v493_v39 = vpack.c.bf16 %v901_v37, %v897_v35 }
 0x1a5   : > { %532 = vmatprep.subr.bf16.mxu1 %v493_v39  ;;  %v993_v39 = vmov 1966171168  }
 0x1a6   : > { %533 = vmatpush1.bf16.msra.mxu1 %v492_v38 }
 0x1a7   : > { %v903_v40 = vpop.eup %902 }
 0x1a8   : > { %v905_v41 = vpop.eup %904 }
 0x1a9   : > { %v907_v42 = vpop.eup %906 }
 0x1aa   : > { %v909_v43 = vpop.eup %908  ;;  %v494_v45 = vpack.c.bf16 %v907_v42, %v903_v40  ;;  %v654_v40 = vunpack.c.l.s4 %v993_v39 }
 0x1ab   : > { %v495_v46 = vpack.c.bf16 %v909_v43, %v905_v41 }
 0x1ad   : > { %534 = vmatprep.subr.bf16.mxu1 %v495_v46  ;;  %v655_v46 = vunpack.c.0.s8 %v654_v40 }
 0x1ae   : > { %535 = vmatpush1.bf16.msra.mxu1 %v494_v45 }
 0x1b1   : > { %760 = vmatmul.mubr.msk.bf16.vlgmr.msra.gmra.mrb[0].mxu1 %vm424_vm0, %v876_v48 }
 0x1b2   : > { %574 = vmatprep.mubr.bf16.mxu1 %v990_v2  ;;  %v509_v2 = vpop.permute.xlu0 %508 }
 0x1b6   : > { %v871_v5 = vpop.permute.xlu0 %870 }
 0x1b7   : > { %v873_v7 = vunpack.i.h.bf16 %v871_v5  ;;  %v872_v8 = vunpack.i.l.bf16 %v871_v5 }
 0x1b9   : > { %761 = vmatmul.mubr.msk.bf16.gmra.mrb[4].mxu1 %vm424_vm0, %v877_v49  ;;  %v646_v49 = vpop.permute.xlu1 %645 }
 0x1ba   : > { %v615_v22 = vpop.permute.xlu0 %614 }
 0x284   : > { %v566_v53 = vpop.f32.mrb[0].mxu1 }
 0x285   : > { %v567_v44 = vadd.f32 %v566_v53, %v499_v51  ;;  %v568_v47 = vpop.f32.mrb[1].mxu1 }
 0x286   : > { %v569_v55 = vadd.f32 %v568_v47, %v499_v51  ;;  %v570_v56 = vpop.f32.mrb[2].mxu1  ;;  %v658_v47 = vsub.s32 %v655_v46, %v1123_v32 }
 0x287   : > { %910 = vtanh.f32 %v567_v44  ;;  %v571_v57 = vadd.f32 %v570_v56, %v504_v54  ;;  %v572_v58 = vpop.f32.mrb[3].mxu1 }
 0x288   : > { %912 = vtanh.f32 %v569_v55  ;;  %v573_v59 = vadd.f32 %v572_v58, %v504_v54 }
 0x289   : > { %914 = vtanh.f32 %v571_v57 }
 0x28a   : > { %916 = vtanh.f32 %v573_v59 }
 0x28c   : > { %v576_v60 = vpop.f32.mrb[4].mxu1 }
 0x28d   : > { %v577_v61 = vadd.f32 %v576_v60, %v509_v2  ;;  %v578_v62 = vpop.f32.mrb[5].mxu1 }
 0x28e   : > { %v579_v0 = vadd.f32 %v578_v62, %v509_v2  ;;  %v580_v1 = vpop.f32.mrb[6].mxu1 }
 0x28f   : > { %918 = vtanh.f32 %v577_v61  ;;  %v581_v3 = vadd.f32 %v580_v1, %v514_v63  ;;  %v582_v50 = vpop.f32.mrb[7].mxu1 }
 0x290   : > { %920 = vtanh.f32 %v579_v0  ;;  %v583_v52 = vadd.f32 %v582_v50, %v514_v63 }
 0x291   : > { %v911_v4 = vpop.eup %910  ;;  %922 = vtanh.f32 %v581_v3 }
 0x292   : > { %v913_v6 = vpop.eup %912  ;;  %924 = vtanh.f32 %v583_v52  ;;  %v617_v11 = vmul.f32 %v911_v4, %v872_v8 }
 0x293   : > { %v915_v9 = vpop.eup %914  ;;  %v618_v13 = vmul.f32 %v913_v6, %v872_v8 }
 0x294   : > { %v917_v10 = vpop.eup %916  ;;  %v619_v12 = vmul.f32 %v915_v9, %v873_v7 }
 0x295   : > { %v620_v14 = vmul.f32 %v917_v10, %v873_v7 }
 0x296   : > { %v625_v15 = vadd.f32 %v619_v12, %v617_v11 }
 0x297   : > { %v634_v16 = vadd.f32 %v620_v14, %v618_v13 }
 0x299   : > { %v919_v17 = vpop.eup %918 }
 0x29a   : > { %v921_v19 = vpop.eup %920  ;;  %v621_v20 = vmul.f32 %v919_v17, %v610_v18 }
 0x29b   : > { %v923_v21 = vpop.eup %922  ;;  %v622_v23 = vmul.f32 %v921_v19, %v610_v18 }
 0x29c   : > { %v925_v24 = vpop.eup %924  ;;  %v626_v25 = vadd.f32 %v625_v15, %v621_v20  ;;  %v623_v26 = vmul.f32 %v923_v21, %v615_v22 }
 0x29d   : > { %v635_v27 = vadd.f32 %v634_v16, %v622_v23  ;;  %v624_v28 = vmul.f32 %v925_v24, %v615_v22 }
 0x29e   : > { %v627_v29 = vadd.f32 %v626_v25, %v623_v26 }
 0x29f   : > { %v636_v30 = vadd.f32 %v635_v27, %v624_v28 }
 0x2a0   : > { %v628_v33 = vrot.slane %v627_v29, 4 }
 0x2a1   : > { %v637_v34 = vrot.slane %v636_v30, 4 }
 0x2a2   : > { %v629_v35 = vadd.f32 %v628_v33, %v627_v29 }
 0x2a3   : > { %v638_v36 = vadd.f32 %v637_v34, %v636_v30 }
 0x2a4   : > { %v630_v37 = vrot.slane %v629_v35, 2 }
 0x2a5   : > { %v639_v38 = vrot.slane %v638_v36, 2 }
 0x2a6   : > { %v631_v41 = vadd.f32 %v630_v37, %v629_v35 }
 0x2a7   : > { %v640_v42 = vadd.f32 %v639_v38, %v638_v36 }
 0x2a8   : > { %v632_v43 = vrot.slane %v631_v41, 1 }
 0x2a9   : > { %v641_v45 = vrot.slane %v640_v42, 1 }
 0x2aa   : > { %v633_v48 = vadd.f32 %v632_v43, %v631_v41 }
 0x2ab   : > { %v642_v51 = vadd.f32 %v641_v45, %v640_v42 }
 0x2ac   : > { %v648_v53 = vadd.f32 %v646_v49, %v633_v48 }
 0x2ad   : > { %v649_v44 = vadd.f32 %v646_v49, %v642_v51 }
 0x2af   : > { %v652_v54 = vcombine.low %v648_v53, %v649_v44 }
 0x2b1   : > { %v659_v55 = vrot.slane %v652_v54, %v658_v47 }
 0x2b3   : > { %v666_v56 = vrot.slane %v659_v55, %v658_v47 }
 0x2b5   : > { %672 = vst.msk [vmem:[%s164_s11] sm:$0x3] %vm670_vm1, %v666_v56 }
 0x2b6   : > { %939 = shalt.err (!%p936_p3)
}
 0x2b7   : > { %s940_s29 = scalar_lea.hbm %s1159_s24, 32  ;;  %s944_s5 = scalar_lea.hbm %s1204_s3, 64 }
 0x2b8   : > { %p941_p4 = scmp.ne.s32.totalorder %s1159_s24, %s940_s29  ;;  %p945_p9 = scmp.lt.u32.totalorder %s1159_s24, %s1204_s3 }
 0x2b9   : > { %p946_p10 = scmp.lt.u32.totalorder %s944_s5, %s940_s29  ;;  %p948_p12 = scmp.lt.u32.totalorder %s940_s29, %s1159_s24 }
 0x2ba   : > { %p942_p7 = pnand %p941_p4, %p1053_p5 }
 0x2bb   : > { %p947_p11 = por %p946_p10, %p945_p9 }
 0x2bc   : > { %p943_p8 = pneg %p942_p7 }
 0x2bd   : > { %p949_p13 = por %p948_p12, %p947_p11 }
 0x2bf   : > { %p950_p0 = pnand %p949_p13, %p943_p8 }
 0x2c1   : > { %953 = shalt.err (!%p950_p0)
}
 0x2c2   : > { %787 = dma.vmem_to_hbm [thread:$0]  (%p1053_p5), %s1161_s17, 32, %s1159_s24, %s674_s25  }
 0x2c3 PF: > { %p793_p1 = scmp.ge.s32.totalorder %s988_s15, 2  ;;  %s700_s8 = sand.u32 1, %s976_s12  }
 0x2c4   : > { %s701_s9 = scalar_lea.sflag [#allocation3], %s700_s8 }
 0x2c5   : > { %p790_p2 = pnand %p793_p1, %p1057_p6 }
 0x2c7   : > { %971 = dma.done.wait (!%p790_p2), %s701_s9, 32  }
 0x2c8   : > { %973 = vsyncadd (!%p790_p2), %s701_s9, 4294967264  ;;  %p13_p3 = scmp.ge.s32.totalorder %s1040_s18, 4   ;;  %s1207_s12 = smov %s980_s13 }
 0x2c9   : > { %s1208_s13 = smov %s984_s14  ;;  %s1209_s14 = smov %s1051_s21 }
 0x2ca   : > { %s1210_s15 = smov %s1040_s18  ;;  %15 = sbr.rel (!%p13_p3) target bundleno = 3 (0x3), region = 67 }
 0x2d1   :  { %706 = vsyncpa [#allocation3], 1 }
 0x2d2   :  { %708 = vsyncpa [#allocation3 + $0x1], 1 }

</bundles_post_ra>
